<compile_context>
chip_gen: v5e
topology: v5e:2x2
jax: 0.10.0
libtpu: 0.0.40
codegen_flags: <defaults>
</compile_context>

<pallas_src>
import jax
import jax.numpy as jnp
from jax.experimental import pallas as pl
from jax.experimental.pallas import tpu as pltpu


def _make_nmn_kernel(S, L, H):
    SH = S * H

    def kernel(x_ref, ps_ref, wx_ref, rw_ref, woutT_ref, bout_ref,
               out_ref, hs_ref, comb_ref):
        # Single invocation, everything VMEM-resident; L is tiny -> unroll.
        x = x_ref[...]                                              # (B, S*H)

        # One x-projection matmul for every (subnetwork, layer):
        #   (B, S*H) @ (S*H, L*S*H) -> lane-dense (B, L*S*H)
        # Columns are ordered [layer, subnet, h] so the layer-l slice below is
        # a contiguous (B, S*H) window.
        xw = jnp.dot(x, wx_ref[...], preferred_element_type=jnp.float32)

        state = ps_ref[...]                                         # (B, S*H)
        acts = []
        for l in range(L):
            # Block-diagonal recurrent matmul fuses all S subnetworks:
            #   relu((x + s@R) @ W^T) == relu(x@W^T + s@(R@W^T))
            act = jnp.maximum(
                xw[:, l * SH:(l + 1) * SH]
                + jnp.dot(state, rw_ref[l],
                          preferred_element_type=jnp.float32),
                0.0)
            acts.append(act)
            state = act

        # Hidden states: one lane-dense (B, L*S*H) slab, single unmasked store.
        hs_ref[...] = jnp.concatenate(acts, axis=-1)
        # Combined activations (== last layer's act of every subnetwork).
        comb_ref[...] = state
        # Final projection directly from the register-resident value
        # (no store->load round trip).
        out_ref[...] = (jnp.dot(state, woutT_ref[...],
                                preferred_element_type=jnp.float32)
                        + bout_ref[...])

    return kernel


def prepare_weights(hebb_weight, hebb_recurrent, out_weight, out_bias):
    """One-time weight plumbing, hoisted out of the per-call path.

    hebb_weight, hebb_recurrent: (S, L, H, H); out_weight: (O, S*H);
    out_bias: (O,).  Returns block-diagonal pre-fused weights for the kernel.
    """
    S, L, H, _ = hebb_weight.shape
    O = out_weight.shape[0]
    SH = S * H

    wT = jnp.swapaxes(hebb_weight, -1, -2)                     # W^T    (S,L,H,H)
    rwT = jnp.einsum('slab,slbc->slac', hebb_recurrent, wT)    # R@W^T  (S,L,H,H)

    # Block-diagonal x-projection weight: (S*H, L*S*H), columns [layer, i, h].
    wx = jnp.zeros((SH, L * SH), dtype=jnp.float32)
    # Block-diagonal (over subnetworks) recurrent weight per layer: (L, S*H, S*H).
    rw_bd = jnp.zeros((L, SH, SH), dtype=jnp.float32)
    for i in range(S):
        for l in range(L):
            wx = wx.at[i * H:(i + 1) * H,
                       l * SH + i * H: l * SH + (i + 1) * H].set(wT[i, l])
            rw_bd = rw_bd.at[l, i * H:(i + 1) * H,
                             i * H:(i + 1) * H].set(rwT[i, l])

    woutT = out_weight.T.astype(jnp.float32)                   # (S*H, O)
    bout2 = out_bias.reshape(1, O).astype(jnp.float32)         # (1, O)
    return wx, rw_bd, woutT, bout2


@jax.jit
def neural_memory_forward(x, prev_states, wx, rw_bd, woutT, bout2):
    """x: (B, S*H); prev_states: (S, B, H); wx/rw_bd/woutT/bout2 from
    prepare_weights().  Returns (final_output, new_states, all_hidden_states,
    combined_activations)."""
    S, B, H = prev_states.shape
    L = rw_bd.shape[0]
    O = woutT.shape[1]
    SH = S * H

    # Lane-concatenated previous state: (B, S*H), lane order [i, h].
    ps_cat = prev_states.transpose(1, 0, 2).reshape(B, SH)

    vmem = lambda: pl.BlockSpec(memory_space=pltpu.MemorySpace.VMEM)
    out_shapes = (
        jax.ShapeDtypeStruct((B, O), jnp.float32),          # final_output
        jax.ShapeDtypeStruct((B, L * SH), jnp.float32),     # hidden-state slab
        jax.ShapeDtypeStruct((B, SH), jnp.float32),         # combined_activations
    )

    # Gridless: total operand footprint is tens of KiB; nothing to pipeline.
    final_out, hs_slab, combined = pl.pallas_call(
        _make_nmn_kernel(S, L, H),
        out_shape=out_shapes,
        in_specs=[vmem() for _ in range(6)],
        out_specs=[vmem() for _ in range(3)],
    )(x, ps_cat, wx, rw_bd, woutT, bout2)

    # Pure layout plumbing (outside the kernel):
    all_hs = hs_slab.reshape(B, L, S, H).transpose(2, 1, 0, 3)   # (S, L, B, H)
    new_states = combined.reshape(B, S, H).transpose(1, 0, 2)    # (S, B, H)
    return final_out, new_states, all_hs, combined


def reference_forward(x, prev_states, hebb_weight, hebb_recurrent,
                      out_weight, out_bias):
    """Pure-JAX reference mirroring the PyTorch module (original association)."""
    S, L, H, _ = hebb_weight.shape
    acts, new_states, all_hs = [], [], []
    for i in range(S):
        xi = x[:, i * H:(i + 1) * H]
        state = prev_states[i]
        hs = []
        for l in range(L):
            combined = xi + state @ hebb_recurrent[i, l]
            act = jnp.maximum(combined @ hebb_weight[i, l].T, 0.0)
            hs.append(act)
            state = act
        all_hs.append(jnp.stack(hs))
        new_states.append(state)
        acts.append(state)
    combined = jnp.concatenate(acts, axis=-1)
    final = combined @ out_weight.T + out_bias
    return final, jnp.stack(new_states), jnp.stack(all_hs), combined


if __name__ == "__main__":
    # Small shapes consistent with the module (input_size == hidden_size is
    # required by the original forward's x.split(hidden_size)).
    B = 8                     # batch (fills a full sublane group)
    H = 32                    # hidden_size (= per-subnetwork input_size)
    S = 2                     # num_subnetworks  -> S*H = 64 lanes
    L = 2                     # num_layers       -> L*S*H = 128 lanes (1 vreg)
    O = 16                    # output_size
    # dopamine_hidden_size is unused in forward(); omitted.

    key = jax.random.PRNGKey(0)
    k_x, k_ps, k_w, k_r, k_ow, k_ob = jax.random.split(key, 6)

    x = jax.random.normal(k_x, (B, S * H), dtype=jnp.float32)
    prev_states = jax.random.normal(k_ps, (S, B, H), dtype=jnp.float32)
    hebb_weight = jax.random.normal(k_w, (S, L, H, H), dtype=jnp.float32)      # (out, in)
    hebb_recurrent = jax.random.normal(k_r, (S, L, H, H), dtype=jnp.float32)
    out_weight = 0.1 * jax.random.normal(k_ow, (O, S * H), dtype=jnp.float32)  # Linear(S*H, O)
    out_bias = 0.1 * jax.random.normal(k_ob, (O,), dtype=jnp.float32)

    # One-time weight transforms (weights are static across calls).
    wx, rw_bd, woutT, bout2 = jax.block_until_ready(
        prepare_weights(hebb_weight, hebb_recurrent, out_weight, out_bias))

    outs = neural_memory_forward(x, prev_states, wx, rw_bd, woutT, bout2)
    outs = jax.block_until_ready(outs)

    refs = reference_forward(x, prev_states, hebb_weight, hebb_recurrent,
                             out_weight, out_bias)
    # The R@W^T / x@W^T pre-fusion reassociates the reference FP math, so the
    # comparison uses a slightly relaxed (but still bug-catching) tolerance.
    for got, want in zip(outs, refs):
        assert got.shape == want.shape, (got.shape, want.shape)
        assert jnp.allclose(got, want, rtol=2e-3, atol=1e-2), "mismatch vs reference"

    # TODO(synk): hebbian_update()/DopamineNetwork are training-time side
    # effects, not part of forward(); intentionally not implemented here.
    print("KERNEL_OK")
</pallas_src>

<mosaic_0001>
module attributes {stable_mosaic.version = 11 : i64} {
  func.func @kernel(%arg0: memref<8x64xf32, #tpu.memory_space<vmem>>, %arg1: memref<8x64xf32, #tpu.memory_space<vmem>>, %arg2: memref<64x128xf32, #tpu.memory_space<vmem>>, %arg3: memref<2x64x64xf32, #tpu.memory_space<vmem>>, %arg4: memref<64x16xf32, #tpu.memory_space<vmem>>, %arg5: memref<1x16xf32, #tpu.memory_space<vmem>>, %arg6: memref<8x16xf32, #tpu.memory_space<vmem>>, %arg7: memref<8x128xf32, #tpu.memory_space<vmem>>, %arg8: memref<8x64xf32, #tpu.memory_space<vmem>>) attributes {dimension_semantics = [], scalar_prefetch = 0 : i64, scratch_operands = 0 : i64, tpu.core_type = #tpu.core_type<tc>} {
    %c0 = arith.constant 0 : index
    %c0_0 = arith.constant 0 : index
    %0 = vector.load %arg0[%c0, %c0_0] : memref<8x64xf32, #tpu.memory_space<vmem>>, vector<8x64xf32>
    %c0_1 = arith.constant 0 : index
    %c0_2 = arith.constant 0 : index
    %1 = vector.load %arg2[%c0_1, %c0_2] : memref<64x128xf32, #tpu.memory_space<vmem>>, vector<64x128xf32>
    %cst = arith.constant dense<0.000000e+00> : vector<8x128xf32>
    %2 = tpu.matmul %0, %1, %cst {dimension_numbers = #tpu.dot_dimension_numbers<[1], [0], [0], [1], [0, 0, 1, 1], [], []>} : vector<8x64xf32>, vector<64x128xf32>, vector<8x128xf32> -> vector<8x128xf32>
    %c0_3 = arith.constant 0 : index
    %c0_4 = arith.constant 0 : index
    %3 = vector.load %arg1[%c0_3, %c0_4] : memref<8x64xf32, #tpu.memory_space<vmem>>, vector<8x64xf32>
    %4 = vector.extract_strided_slice %2 {offsets = [0, 0], sizes = [8, 64], strides = [1, 1]} : vector<8x128xf32> to vector<8x64xf32>
    %c0_5 = arith.constant 0 : index
    %c0_6 = arith.constant 0 : index
    %c0_7 = arith.constant 0 : index
    %5 = vector.load %arg3[%c0_5, %c0_6, %c0_7] : memref<2x64x64xf32, #tpu.memory_space<vmem>>, vector<1x64x64xf32>
    %6 = vector.shape_cast %5 : vector<1x64x64xf32> to vector<64x64xf32>
    %cst_8 = arith.constant dense<0.000000e+00> : vector<8x64xf32>
    %7 = tpu.matmul %3, %6, %cst_8 {dimension_numbers = #tpu.dot_dimension_numbers<[1], [0], [0], [1], [0, 0, 1, 1], [], []>} : vector<8x64xf32>, vector<64x64xf32>, vector<8x64xf32> -> vector<8x64xf32>
    %8 = arith.addf %4, %7 : vector<8x64xf32>
    %cst_9 = arith.constant 0.000000e+00 : f32
    %9 = vector.broadcast %cst_9 : f32 to vector<8x64xf32>
    %10 = arith.maximumf %8, %9 : vector<8x64xf32>
    %11 = vector.extract_strided_slice %2 {offsets = [0, 64], sizes = [8, 64], strides = [1, 1]} : vector<8x128xf32> to vector<8x64xf32>
    %c1 = arith.constant 1 : index
    %c0_10 = arith.constant 0 : index
    %c0_11 = arith.constant 0 : index
    %12 = vector.load %arg3[%c1, %c0_10, %c0_11] : memref<2x64x64xf32, #tpu.memory_space<vmem>>, vector<1x64x64xf32>
    %13 = vector.shape_cast %12 : vector<1x64x64xf32> to vector<64x64xf32>
    %cst_12 = arith.constant dense<0.000000e+00> : vector<8x64xf32>
    %14 = tpu.matmul %10, %13, %cst_12 {dimension_numbers = #tpu.dot_dimension_numbers<[1], [0], [0], [1], [0, 0, 1, 1], [], []>} : vector<8x64xf32>, vector<64x64xf32>, vector<8x64xf32> -> vector<8x64xf32>
    %15 = arith.addf %11, %14 : vector<8x64xf32>
    %cst_13 = arith.constant 0.000000e+00 : f32
    %16 = vector.broadcast %cst_13 : f32 to vector<8x64xf32>
    %17 = arith.maximumf %15, %16 : vector<8x64xf32>
    %18 = tpu.concatenate %10, %17 in 1 : vector<8x64xf32>, vector<8x64xf32> -> vector<8x128xf32>
    %c0_14 = arith.constant 0 : index
    %c0_15 = arith.constant 0 : index
    %19 = vector.load %arg7[%c0_14, %c0_15] : memref<8x128xf32, #tpu.memory_space<vmem>>, vector<8x128xf32>
    tpu.vector_store %arg7[%c0_14, %c0_15], %18 {strides = array<i32>} : memref<8x128xf32, #tpu.memory_space<vmem>>, vector<8x128xf32>,
    %c0_16 = arith.constant 0 : index
    %c0_17 = arith.constant 0 : index
    %20 = vector.load %arg8[%c0_16, %c0_17] : memref<8x64xf32, #tpu.memory_space<vmem>>, vector<8x64xf32>
    tpu.vector_store %arg8[%c0_16, %c0_17], %17 {strides = array<i32>} : memref<8x64xf32, #tpu.memory_space<vmem>>, vector<8x64xf32>,
    %c0_18 = arith.constant 0 : index
    %c0_19 = arith.constant 0 : index
    %21 = vector.load %arg4[%c0_18, %c0_19] : memref<64x16xf32, #tpu.memory_space<vmem>>, vector<64x16xf32>
    %cst_20 = arith.constant dense<0.000000e+00> : vector<8x16xf32>
    %22 = tpu.matmul %17, %21, %cst_20 {dimension_numbers = #tpu.dot_dimension_numbers<[1], [0], [0], [1], [0, 0, 1, 1], [], []>} : vector<8x64xf32>, vector<64x16xf32>, vector<8x16xf32> -> vector<8x16xf32>
    %c0_21 = arith.constant 0 : index
    %c0_22 = arith.constant 0 : index
    %23 = vector.load %arg5[%c0_21, %c0_22] : memref<1x16xf32, #tpu.memory_space<vmem>>, vector<1x16xf32>
    %24 = vector.broadcast %23 : vector<1x16xf32> to vector<8x16xf32>
    %25 = arith.addf %22, %24 : vector<8x16xf32>
    %c0_23 = arith.constant 0 : index
    %c0_24 = arith.constant 0 : index
    %26 = vector.load %arg6[%c0_23, %c0_24] : memref<8x16xf32, #tpu.memory_space<vmem>>, vector<8x16xf32>
    tpu.vector_store %arg6[%c0_23, %c0_24], %25 {strides = array<i32>} : memref<8x16xf32, #tpu.memory_space<vmem>>, vector<8x16xf32>,
    return
  }
}

</mosaic_0001>

<bundles_post_ra>
// kernel: neural_memory_forward.1
= control target key start
LH: loop header
LB: loop body
LE: loop exit
PB: predicated region body
PF: predicated region fallthrough
CT: control target
= control target key end

     0   :  { %14 = vsyncpa [#allocation3], 0  ;;  %s403_s0 = inlined_call_operand.vmem [shape: f32[8,64], index: 0, kind: input, shape index: {}]   ;;  %s404_s1 = inlined_call_operand.vmem [shape: f32[8,64], index: 1, kind: input, shape index: {}]   ;;  %s405_s2 = inlined_call_operand.vmem [shape: f32[64,128], index: 2, kind: input, shape index: {}]   ;;  %s406_s3 = inlined_call_operand.hbm [shape: f32[2,64,64], index: 3, kind: input, shape index: {}]   ;;  %s407_s4 = inlined_call_operand.vmem [shape: f32[64,16], index: 4, kind: input, shape index: {}]   ;;  %s408_s5 = inlined_call_operand.vmem [shape: f32[1,16], index: 5, kind: input, shape index: {}]   ;;  %s409_s6 = inlined_call_operand.hbm [shape: f32[8,16], index: 6, kind: output, shape index: {0}]   ;;  %s410_s7 = inlined_call_operand.vmem [shape: f32[8,128], index: 7, kind: output, shape index: {1}]   ;;  %s411_s8 = inlined_call_operand.vmem [shape: f32[8,64], index: 8, kind: output, shape index: {2}]  }
   0x1   :  { %15 = vsyncpa [#allocation4], 0  ;;  %s26_s29 = sshll.u32 %s406_s3, 4  ;;  %s278_s30 = smov [#allocation2]   ;;  %s27_s29 = int_to_ptr.hbm [resolvable:$true] %s26_s29 }
   0x2   :  { %s28_s9 = sshll.u32 %s278_s30, 4  ;;  %s279_s10 = smov 128   ;;  %s29_s9 = int_to_ptr.vmem [resolvable:$true] %s28_s9 }
   0x3   :  { %s280_s11 = smov 8  }
   0x4   :  { %34 = dma.hbm_to_vmem [thread:$0]  %s27_s29, 2048, %s29_s9, [#allocation3], %s279_s10, %s279_s10, %s280_s11  }
   0x5   :  { %274 = dma.done.wait [#allocation3], 2048  }
   0x6   :  { %275 = vsyncadd [#allocation3], 4294965248  ;;  %v51_v0 = vld [vmem:[%s405_s2 + $0x38] sm:$0xff]  ;;  %v50_v2 = vld [vmem:[%s405_s2 + $0x30] sm:$0xff]  ;;  %vm52_vm0 = vcmask 523264   ;;  %s282_s27 = smov [#allocation5]  }
   0x7   :  { %v84_v1 = vld [vmem:[#allocation2 + $0x38] sm:$0xff]  ;;  %64 = vmatpush.msra.mxu0 %v51_v0  ;;  %v83_v3 = vld [vmem:[#allocation2 + $0x30] sm:$0xff]  ;;  %v49_v4 = vld [vmem:[%s405_s2 + $0x28] sm:$0xff]  ;;  %s196_s28 = sshll.u32 %s282_s27, 4  ;;  %vm189_vm1 = vcmask 130048   ;;  %s197_s28 = int_to_ptr.vmem [resolvable:$true] %s196_s28 }
   0x8   :  { %96 = vmatpush.msra.mxu1 %v84_v1  ;;  %v82_v5 = vld [vmem:[#allocation2 + $0x28] sm:$0xff]  ;;  %v48_v6 = vld [vmem:[%s405_s2 + $0x20] sm:$0xff]  ;;  %v47_v8 = vld [vmem:[%s405_s2 + $0x18] sm:$0xff] }
   0x9   :  { %65 = vmatpush.msra.mxu0 %v50_v2  ;;  %v81_v7 = vld [vmem:[#allocation2 + $0x20] sm:$0xff]  ;;  %v80_v9 = vld [vmem:[#allocation2 + $0x18] sm:$0xff]  ;;  %v117_v11 = vld [vmem:[#allocation2 + $0x70] sm:$0xff] }
   0xa   :  { %97 = vmatpush.msra.mxu1 %v83_v3  ;;  %v118_v10 = vld [vmem:[#allocation2 + $0x78] sm:$0xff]  ;;  %v46_v12 = vld [vmem:[%s405_s2 + $0x10] sm:$0xff]  ;;  %v116_v14 = vld [vmem:[#allocation2 + $0x68] sm:$0xff] }
   0xb   :  { %66 = vmatpush.msra.mxu0 %v49_v4  ;;  %v79_v13 = vld [vmem:[#allocation2 + $0x10] sm:$0xff]  ;;  %130 = vmatpush.msra.mxu2 %v118_v10  ;;  %v45_v15 = vld [vmem:[%s405_s2 + $0x8] sm:$0xff]  ;;  %v115_v17 = vld [vmem:[#allocation2 + $0x60] sm:$0xff] }
   0xc   :  { %98 = vmatpush.msra.mxu1 %v82_v5  ;;  %v78_v16 = vld [vmem:[#allocation2 + $0x8] sm:$0xff]  ;;  %v44_v18 = vld [vmem:[%s405_s2] sm:$0xff]  ;;  %v114_v22 = vld [vmem:[#allocation2 + $0x58] sm:$0xff] }
   0xd   :  { %67 = vmatpush.msra.mxu0 %v48_v6  ;;  %131 = vmatpush.msra.mxu2 %v117_v11  ;;  %v77_v19 = vld [vmem:[#allocation2] sm:$0xff]  ;;  %v113_v23 = vld [vmem:[#allocation2 + $0x50] sm:$0xff]  ;;  %v112_v24 = vld [vmem:[#allocation2 + $0x48] sm:$0xff] }
   0xe   :  { %99 = vmatpush.msra.mxu1 %v81_v7  ;;  %v43_v20 = vld [vmem:[%s403_s0] sm:$0xff]  ;;  %s281_s0 = smov 64   ;;  %v162_v31 = vld [vmem:[%s407_s4 + $0x38] sm:$0xff]  ;;  %v161_v32 = vld [vmem:[%s407_s4 + $0x30] sm:$0xff] }
   0xf   :  { %68 = vmatpush.msra.mxu0 %v47_v8  ;;  %132 = vmatpush.msra.mxu2 %v116_v14  ;;  %v76_v21 = vld [vmem:[%s404_s1] sm:$0xff]  ;;  %v160_v33 = vld [vmem:[%s407_s4 + $0x28] sm:$0xff]  ;;  %v158_v35 = vld [vmem:[%s407_s4 + $0x18] sm:$0xff] }
  0x10   :  { %100 = vmatpush.msra.mxu1 %v80_v9  ;;  %v111_v25 = vld [vmem:[#allocation2 + $0x40] sm:$0xff]  ;;  %177 = vmatpush.msra.mxu3 %v162_v31  ;;  %v157_v36 = vld [vmem:[%s407_s4 + $0x10] sm:$0xff]  ;;  %v156_v37 = vld [vmem:[%s407_s4 + $0x8] sm:$0xff] }
  0x11   :  { %69 = vmatpush.msra.mxu0 %v46_v12  ;;  %133 = vmatpush.msra.mxu2 %v115_v17  ;;  %v159_v34 = vld [vmem:[%s407_s4 + $0x20] sm:$0xff] }
  0x12   :  { %101 = vmatpush.msra.mxu1 %v79_v13  ;;  %178 = vmatpush.msra.mxu3 %v161_v32  ;;  %v155_v38 = vld [vmem:[%s407_s4] sm:$0xff] }
  0x13   :  { %70 = vmatpush.msra.mxu0 %v45_v15  ;;  %134 = vmatpush.msra.mxu2 %v114_v22  ;;  %v225_v44 = vld [vmem:[%s408_s5] ss:$0 sm:$0xff] }
  0x14   :  { %102 = vmatpush.msra.mxu1 %v78_v16  ;;  %179 = vmatpush.msra.mxu3 %v160_v33 }
  0x15   :  { %71 = vmatpush.msra.mxu0 %v44_v18  ;;  %135 = vmatpush.msra.mxu2 %v113_v23 }
  0x16   :  { %103 = vmatpush.msra.mxu1 %v77_v19  ;;  %216 = vmatmul.msk.f32.vlgmr.msra.gmra.mxu0 %vm52_vm0, %v43_v20 }
  0x17   :  { %217 = vmatmul.msk.f32.vlgmr.msra.gmra.mxu1 %vm52_vm0, %v76_v21  ;;  %136 = vmatpush.msra.mxu2 %v112_v24 }
  0x18   :  { %180 = vmatpush.msra.mxu3 %v159_v34 }
  0x19   :  { %137 = vmatpush.msra.mxu2 %v111_v25 }
  0x1a   :  { %181 = vmatpush.msra.mxu3 %v158_v35 }
  0x1c   :  { %182 = vmatpush.msra.mxu3 %v157_v36 }
  0x1e   :  { %183 = vmatpush.msra.mxu3 %v156_v37 }
  0x20   :  { %184 = vmatpush.msra.mxu3 %v155_v38 }
  0x93   :  { %v73_v26 = vpop.f32.mrf.mxu0 }
  0x94   :  { %v105_v27 = vpop.f32.mrf.mxu1 }
  0x95   :  { %v108_v28 = vadd.f32 %v105_v27, %v73_v26 }
  0x97   :  { %v109_v29 = vmax.f32 %v108_v28, 0.0 }
  0x99   :  { %218 = vmatmul.msk.f32.vlgmr.msra.gmra.mxu2 %vm52_vm0, %v109_v29 }
 0x11c   :  { %v139_v30 = vpop.f32.mrf.mxu2 }
 0x11d   :  { %143 = vrot.lane.b32.xlu0 %v139_v30, %s281_s0 }
 0x18f   :  { %v144_v39 = vpop.permute.xlu0 %143 }
 0x190   :  { %v146_v40 = vadd.f32 %v144_v39, %v73_v26 }
 0x192   :  { %v147_v41 = vmax.f32 %v146_v40, 0.0 }
 0x194   :  { %v148_v42 = vsel %vm52_vm0, %v109_v29, %v147_v41  ;;  %151 = vrot.lane.b32.xlu0 %v147_v41, %s281_s0  ;;  %s198_s0 = sshll.u32 %s409_s6, 4  ;;  %s199_s0 = int_to_ptr.hbm [resolvable:$true] %s198_s0 }
 0x195   :  { %149 = vst [vmem:[%s410_s7] sm:$0xff] %v148_v42 }
 0x206   :  { %v152_v43 = vpop.permute.xlu0 %151 }
 0x207   :  { %154 = vst.msk [vmem:[%s411_s8] sm:$0xff] %vm52_vm0, %v152_v43  ;;  %219 = vmatmul.msk.f32.vlgmr.msra.gmra.mxu3 %vm52_vm0, %v152_v43 }
 0x28a   :  { %v186_v45 = vpop.f32.mrf.mxu3 }
 0x28b   :  { %v187_v46 = vadd.f32 %v225_v44, %v186_v45 }
 0x28d   :  { %190 = vst.msk [vmem:[#allocation5] sm:$0xff] %vm189_vm1, %v187_v46 }
 0x28e   :  { %201 = dma.vmem_to_hbm [thread:$0]  %s197_s28, 128, %s199_s0, [#allocation4]  }
 0x28f   :  { %276 = dma.done.wait [#allocation4], 128  }
 0x290   :  { %277 = vsyncadd [#allocation4], 4294967168 }
 0x291   :  { %214 = vsyncpa [#allocation3], 1 }
 0x292   :  { %215 = vsyncpa [#allocation4], 1 }

</bundles_post_ra>
